<compile_context>
chip_gen: v7x
topology: tpu7x:2x2x1
jax: 0.10.0
libtpu: 0.0.40
codegen_flags: <defaults>
</compile_context>

<pallas_src>
import jax
import jax.numpy as jnp
from jax.experimental import pallas as pl
from jax.experimental.pallas import tpu as pltpu

# ---------------- dimensions (from the module __init__) ----------------
D_IN = 1728
H1, H2, H3, D_OUT = 100, 25, 100, 3
H_PAD = 128   # 100 / 25 / 100 / 3 all padded to one 128-lane group


def colornet_kernel(x_ref, w1_ref, b1_ref, w2_ref, b2_ref,
                    w3_ref, b3_ref, w4_ref, b4_ref, o_ref):
    """Fused 4-layer MLP on one (tm, 1728) batch tile.

    Dropout layers are inference-mode (identity), matching model.eval().
    Dots accumulate in f32; elementwise bias+ReLU math stays f32 regardless
    of the streaming dtype of x / w1.
    """
    # fc1 + ReLU  (drop_2: identity at inference time)
    h = jnp.dot(x_ref[...], w1_ref[...], preferred_element_type=jnp.float32)
    h = jnp.maximum(h + b1_ref[...], 0.0)                                # (tm, 128)

    # fc2 + ReLU
    h = jnp.dot(h, w2_ref[...], preferred_element_type=jnp.float32)
    h = jnp.maximum(h + b2_ref[...], 0.0)                                # (tm, 128)

    # fc3 + ReLU  (drop_3: identity at inference time)
    h = jnp.dot(h, w3_ref[...], preferred_element_type=jnp.float32)
    h = jnp.maximum(h + b3_ref[...], 0.0)                                # (tm, 128)

    # fc4
    out = jnp.dot(h, w4_ref[...], preferred_element_type=jnp.float32)
    o_ref[...] = (out + b4_ref[...]).astype(o_ref.dtype)                 # (tm, 128)


def _pad_to(a, shape):
    return jnp.pad(a, [(0, t - s) for s, t in zip(a.shape, shape)])


def colornet_forward(x, params, *, tm=1024):
    """x: (B, 1728), float32 or bf16 (bf16 at rest halves the dominant HBM read).

    params: dict of (in, out) weights / (1, out) biases (f32).
    Returns (B, 3) float32.
    """
    B, D = x.shape
    assert D == D_IN

    # Clamp the batch tile to the actual batch (rounded to the sublane
    # multiple for the streaming dtype) so small-batch latency ~ B.
    sub = 16 if x.dtype == jnp.bfloat16 else 8
    tm = int(max(sub, min(tm, pl.cdiv(B, sub) * sub)))
    grid = (pl.cdiv(B, tm),)

    # Lane-pad parameters to 128-wide layers (zero padding is numerically
    # exact through matmul + bias + ReLU).  Weights are tiny; w1 is cast to
    # x's dtype so the first (dominant) matmul streams x unconverted.
    w1 = _pad_to(params["w1"], (D_IN, H_PAD)).astype(x.dtype)
    b1 = _pad_to(params["b1"], (1, H_PAD))
    w2 = _pad_to(params["w2"], (H_PAD, H_PAD))
    b2 = _pad_to(params["b2"], (1, H_PAD))
    w3 = _pad_to(params["w3"], (H_PAD, H_PAD))
    b3 = _pad_to(params["b3"], (1, H_PAD))
    w4 = _pad_to(params["w4"], (H_PAD, H_PAD))
    b4 = _pad_to(params["b4"], (1, H_PAD))

    # Constant index_map keeps weights/biases VMEM-resident across grid steps.
    full = lambda a: pl.BlockSpec(a.shape, lambda i: (0, 0))

    x_item = jnp.dtype(x.dtype).itemsize
    flops = 2 * B * (D_IN * H_PAD + 3 * H_PAD * H_PAD)
    bytes_accessed = (B * D_IN * x_item                 # x read (unpadded, in place)
                      + B * H_PAD * 4                   # out write
                      + D_IN * H_PAD * x_item           # w1
                      + 3 * H_PAD * H_PAD * 4           # w2..w4
                      + 4 * H_PAD * 4)                  # biases

    out_padded = pl.pallas_call(
        colornet_kernel,
        out_shape=jax.ShapeDtypeStruct((B, H_PAD), jnp.float32),
        grid_spec=pltpu.PrefetchScalarGridSpec(
            num_scalar_prefetch=0,
            grid=grid,
            in_specs=[
                # x: full 1728-wide (== array dim) block, tiled over batch only.
                pl.BlockSpec((tm, D_IN), lambda i: (i, 0)),
                full(w1), full(b1),
                full(w2), full(b2),
                full(w3), full(b3),
                full(w4), full(b4),
            ],
            out_specs=pl.BlockSpec((tm, H_PAD), lambda i: (i, 0)),
        ),
        compiler_params=pltpu.CompilerParams(
            dimension_semantics=("parallel",),
            vmem_limit_bytes=48 << 20,   # tm=1024 f32 x double-buffer > 16 MiB (v5e default)
        ),
        cost_estimate=pl.CostEstimate(
            flops=int(flops), transcendentals=0,
            bytes_accessed=int(bytes_accessed)),
    )(x, w1, b1, w2, b2, w3, b3, w4, b4)

    # Only the first 3 output lanes are real; rows beyond B never exist
    # (edge blocks are masked on store), so just drop the padded lanes.
    return out_padded[:, :D_OUT]


def init_params(key):
    """Deterministic synthetic parameters (PyTorch Linear init, pre-transposed)."""
    ks = jax.random.split(key, 8)

    def linear(kw, kb, fan_in, fan_out):
        bound = 1.0 / jnp.sqrt(fan_in)
        # PyTorch stores weight as (out, in); transpose to (in, out) for x @ W.
        w = jax.random.uniform(kw, (fan_out, fan_in), jnp.float32, -bound, bound).T
        b = jax.random.uniform(kb, (1, fan_out), jnp.float32, -bound, bound)
        return w, b

    w1, b1 = linear(ks[0], ks[1], D_IN, H1)
    w2, b2 = linear(ks[2], ks[3], H1, H2)
    w3, b3 = linear(ks[4], ks[5], H2, H3)
    w4, b4 = linear(ks[6], ks[7], H3, D_OUT)
    return dict(w1=w1, b1=b1, w2=w2, b2=b2, w3=w3, b3=b3, w4=w4, b4=b4)


def colornet_ref(x, p):
    """Pure-JAX reference of the same forward pass (dropout = identity)."""
    h = jnp.maximum(x @ p["w1"] + p["b1"], 0.0)
    h = jnp.maximum(h @ p["w2"] + p["b2"], 0.0)
    h = jnp.maximum(h @ p["w3"] + p["b3"], 0.0)
    return h @ p["w4"] + p["b4"]


if __name__ == "__main__":
    key = jax.random.PRNGKey(0)
    k_x, k_p = jax.random.split(key)

    B = 8  # small demo batch; tm auto-clamps to 8 (no padding, single grid step)
    x = jax.random.uniform(k_x, (B, D_IN), jnp.float32)  # preprocessed image rows
    params = init_params(k_p)

    out = colornet_forward(x, params)          # f32 path (exact vs reference)
    out = jax.block_until_ready(out)

    ref = colornet_ref(x, params)
    assert out.shape == (B, D_OUT)
    assert jnp.allclose(out, ref, atol=1e-4, rtol=1e-4)

    print("KERNEL_OK")
</pallas_src>

<mosaic_0001>
module attributes {stable_mosaic.version = 11 : i64} {
  func.func @colornet_kernel(%arg0: i32, %arg1: memref<8x1728xf32, #tpu.memory_space<vmem>>, %arg2: memref<1728x128xf32, #tpu.memory_space<vmem>>, %arg3: memref<1x128xf32, #tpu.memory_space<vmem>>, %arg4: memref<128x128xf32, #tpu.memory_space<vmem>>, %arg5: memref<1x128xf32, #tpu.memory_space<vmem>>, %arg6: memref<128x128xf32, #tpu.memory_space<vmem>>, %arg7: memref<1x128xf32, #tpu.memory_space<vmem>>, %arg8: memref<128x128xf32, #tpu.memory_space<vmem>>, %arg9: memref<1x128xf32, #tpu.memory_space<vmem>>, %arg10: memref<8x128xf32, #tpu.memory_space<vmem>>) attributes {dimension_semantics = [#tpu.dimension_semantics<parallel>], iteration_bounds = array<i64: 1>, scalar_prefetch = 0 : i64, scratch_operands = 0 : i64, tpu.core_type = #tpu.core_type<tc>, window_params = [{transform_indices = @transform_0, window_bounds = array<i64: 8, 1728>}, {pipeline_mode = #tpu.pipeline_mode<synchronous>, transform_indices = @transform_1, window_bounds = array<i64: 1728, 128>}, {pipeline_mode = #tpu.pipeline_mode<synchronous>, transform_indices = @transform_2, window_bounds = array<i64: 1, 128>}, {pipeline_mode = #tpu.pipeline_mode<synchronous>, transform_indices = @transform_3, window_bounds = array<i64: 128, 128>}, {pipeline_mode = #tpu.pipeline_mode<synchronous>, transform_indices = @transform_4, window_bounds = array<i64: 1, 128>}, {pipeline_mode = #tpu.pipeline_mode<synchronous>, transform_indices = @transform_5, window_bounds = array<i64: 128, 128>}, {pipeline_mode = #tpu.pipeline_mode<synchronous>, transform_indices = @transform_6, window_bounds = array<i64: 1, 128>}, {pipeline_mode = #tpu.pipeline_mode<synchronous>, transform_indices = @transform_7, window_bounds = array<i64: 128, 128>}, {pipeline_mode = #tpu.pipeline_mode<synchronous>, transform_indices = @transform_8, window_bounds = array<i64: 1, 128>}, {transform_indices = @transform_9, window_bounds = array<i64: 8, 128>}]} {
    %c0 = arith.constant 0 : index
    %c0_0 = arith.constant 0 : index
    %0 = vector.load %arg1[%c0, %c0_0] : memref<8x1728xf32, #tpu.memory_space<vmem>>, vector<8x1728xf32>
    %c0_1 = arith.constant 0 : index
    %c0_2 = arith.constant 0 : index
    %1 = vector.load %arg2[%c0_1, %c0_2] : memref<1728x128xf32, #tpu.memory_space<vmem>>, vector<1728x128xf32>
    %cst = arith.constant dense<0.000000e+00> : vector<8x128xf32>
    %2 = tpu.matmul %0, %1, %cst {dimension_numbers = #tpu.dot_dimension_numbers<[1], [0], [0], [1], [0, 0, 1, 1], [], []>} : vector<8x1728xf32>, vector<1728x128xf32>, vector<8x128xf32> -> vector<8x128xf32>
    %c0_3 = arith.constant 0 : index
    %c0_4 = arith.constant 0 : index
    %3 = vector.load %arg3[%c0_3, %c0_4] : memref<1x128xf32, #tpu.memory_space<vmem>>, vector<1x128xf32>
    %4 = vector.broadcast %3 : vector<1x128xf32> to vector<8x128xf32>
    %5 = arith.addf %2, %4 : vector<8x128xf32>
    %cst_5 = arith.constant 0.000000e+00 : f32
    %6 = vector.broadcast %cst_5 : f32 to vector<8x128xf32>
    %7 = arith.maximumf %5, %6 : vector<8x128xf32>
    %c0_6 = arith.constant 0 : index
    %c0_7 = arith.constant 0 : index
    %8 = vector.load %arg4[%c0_6, %c0_7] : memref<128x128xf32, #tpu.memory_space<vmem>>, vector<128x128xf32>
    %cst_8 = arith.constant dense<0.000000e+00> : vector<8x128xf32>
    %9 = tpu.matmul %7, %8, %cst_8 {dimension_numbers = #tpu.dot_dimension_numbers<[1], [0], [0], [1], [0, 0, 1, 1], [], []>} : vector<8x128xf32>, vector<128x128xf32>, vector<8x128xf32> -> vector<8x128xf32>
    %c0_9 = arith.constant 0 : index
    %c0_10 = arith.constant 0 : index
    %10 = vector.load %arg5[%c0_9, %c0_10] : memref<1x128xf32, #tpu.memory_space<vmem>>, vector<1x128xf32>
    %11 = vector.broadcast %10 : vector<1x128xf32> to vector<8x128xf32>
    %12 = arith.addf %9, %11 : vector<8x128xf32>
    %cst_11 = arith.constant 0.000000e+00 : f32
    %13 = vector.broadcast %cst_11 : f32 to vector<8x128xf32>
    %14 = arith.maximumf %12, %13 : vector<8x128xf32>
    %c0_12 = arith.constant 0 : index
    %c0_13 = arith.constant 0 : index
    %15 = vector.load %arg6[%c0_12, %c0_13] : memref<128x128xf32, #tpu.memory_space<vmem>>, vector<128x128xf32>
    %cst_14 = arith.constant dense<0.000000e+00> : vector<8x128xf32>
    %16 = tpu.matmul %14, %15, %cst_14 {dimension_numbers = #tpu.dot_dimension_numbers<[1], [0], [0], [1], [0, 0, 1, 1], [], []>} : vector<8x128xf32>, vector<128x128xf32>, vector<8x128xf32> -> vector<8x128xf32>
    %c0_15 = arith.constant 0 : index
    %c0_16 = arith.constant 0 : index
    %17 = vector.load %arg7[%c0_15, %c0_16] : memref<1x128xf32, #tpu.memory_space<vmem>>, vector<1x128xf32>
    %18 = vector.broadcast %17 : vector<1x128xf32> to vector<8x128xf32>
    %19 = arith.addf %16, %18 : vector<8x128xf32>
    %cst_17 = arith.constant 0.000000e+00 : f32
    %20 = vector.broadcast %cst_17 : f32 to vector<8x128xf32>
    %21 = arith.maximumf %19, %20 : vector<8x128xf32>
    %c0_18 = arith.constant 0 : index
    %c0_19 = arith.constant 0 : index
    %22 = vector.load %arg8[%c0_18, %c0_19] : memref<128x128xf32, #tpu.memory_space<vmem>>, vector<128x128xf32>
    %cst_20 = arith.constant dense<0.000000e+00> : vector<8x128xf32>
    %23 = tpu.matmul %21, %22, %cst_20 {dimension_numbers = #tpu.dot_dimension_numbers<[1], [0], [0], [1], [0, 0, 1, 1], [], []>} : vector<8x128xf32>, vector<128x128xf32>, vector<8x128xf32> -> vector<8x128xf32>
    %c0_21 = arith.constant 0 : index
    %c0_22 = arith.constant 0 : index
    %24 = vector.load %arg9[%c0_21, %c0_22] : memref<1x128xf32, #tpu.memory_space<vmem>>, vector<1x128xf32>
    %25 = vector.broadcast %24 : vector<1x128xf32> to vector<8x128xf32>
    %26 = arith.addf %23, %25 : vector<8x128xf32>
    %c0_23 = arith.constant 0 : index
    %c0_24 = arith.constant 0 : index
    %27 = vector.load %arg10[%c0_23, %c0_24] : memref<8x128xf32, #tpu.memory_space<vmem>>, vector<8x128xf32>
    tpu.vector_store %arg10[%c0_23, %c0_24], %26 {strides = array<i32>} : memref<8x128xf32, #tpu.memory_space<vmem>>, vector<8x128xf32>,
    return
  }
  func.func @transform_0(%arg0: i32) -> (i32, i32) {
    %c0_i32 = arith.constant 0 : i32
    %c0_i32_0 = arith.constant 0 : i32
    return %arg0, %c0_i32 : i32, i32
  }
  func.func @transform_1(%arg0: i32) -> (i32, i32) {
    %c0_i32 = arith.constant 0 : i32
    %c0_i32_0 = arith.constant 0 : i32
    %c0_i32_1 = arith.constant 0 : i32
    return %c0_i32, %c0_i32_0 : i32, i32
  }
  func.func @transform_2(%arg0: i32) -> (i32, i32) {
    %c0_i32 = arith.constant 0 : i32
    %c0_i32_0 = arith.constant 0 : i32
    %c0_i32_1 = arith.constant 0 : i32
    return %c0_i32, %c0_i32_0 : i32, i32
  }
  func.func @transform_3(%arg0: i32) -> (i32, i32) {
    %c0_i32 = arith.constant 0 : i32
    %c0_i32_0 = arith.constant 0 : i32
    %c0_i32_1 = arith.constant 0 : i32
    return %c0_i32, %c0_i32_0 : i32, i32
  }
  func.func @transform_4(%arg0: i32) -> (i32, i32) {
    %c0_i32 = arith.constant 0 : i32
    %c0_i32_0 = arith.constant 0 : i32
    %c0_i32_1 = arith.constant 0 : i32
    return %c0_i32, %c0_i32_0 : i32, i32
  }
  func.func @transform_5(%arg0: i32) -> (i32, i32) {
    %c0_i32 = arith.constant 0 : i32
    %c0_i32_0 = arith.constant 0 : i32
    %c0_i32_1 = arith.constant 0 : i32
    return %c0_i32, %c0_i32_0 : i32, i32
  }
  func.func @transform_6(%arg0: i32) -> (i32, i32) {
    %c0_i32 = arith.constant 0 : i32
    %c0_i32_0 = arith.constant 0 : i32
    %c0_i32_1 = arith.constant 0 : i32
    return %c0_i32, %c0_i32_0 : i32, i32
  }
  func.func @transform_7(%arg0: i32) -> (i32, i32) {
    %c0_i32 = arith.constant 0 : i32
    %c0_i32_0 = arith.constant 0 : i32
    %c0_i32_1 = arith.constant 0 : i32
    return %c0_i32, %c0_i32_0 : i32, i32
  }
  func.func @transform_8(%arg0: i32) -> (i32, i32) {
    %c0_i32 = arith.constant 0 : i32
    %c0_i32_0 = arith.constant 0 : i32
    %c0_i32_1 = arith.constant 0 : i32
    return %c0_i32, %c0_i32_0 : i32, i32
  }
  func.func @transform_9(%arg0: i32) -> (i32, i32) {
    %c0_i32 = arith.constant 0 : i32
    %c0_i32_0 = arith.constant 0 : i32
    return %arg0, %c0_i32 : i32, i32
  }
}

</mosaic_0001>

<bundles_post_ra>
// kernel: tpu_custom_call.1
= control target key start
LH: loop header
LB: loop body
LE: loop exit
PB: predicated region body
PF: predicated region fallthrough
CT: control target
= control target key end

     0   :  { %14 = vsyncpa [#allocation3], 0  ;;  %s2148_s0 = inlined_call_operand.hbm [shape: f32[8,1728], index: 0, kind: input, shape index: {}]   ;;  %s2149_s1 = inlined_call_operand.hbm [shape: f32[1728,128], index: 1, kind: input, shape index: {}]   ;;  %s2150_s2 = inlined_call_operand.vmem [shape: f32[1,128], index: 2, kind: input, shape index: {}]   ;;  %s2151_s3 = inlined_call_operand.hbm [shape: f32[128,128], index: 3, kind: input, shape index: {}]   ;;  %s2152_s4 = inlined_call_operand.vmem [shape: f32[1,128], index: 4, kind: input, shape index: {}]   ;;  %s2153_s5 = inlined_call_operand.hbm [shape: f32[128,128], index: 5, kind: input, shape index: {}]   ;;  %s2154_s6 = inlined_call_operand.vmem [shape: f32[1,128], index: 6, kind: input, shape index: {}]   ;;  %s2155_s7 = inlined_call_operand.hbm [shape: f32[128,128], index: 7, kind: input, shape index: {}]   ;;  %s2156_s8 = inlined_call_operand.vmem [shape: f32[1,128], index: 8, kind: input, shape index: {}]   ;;  %s2157_s9 = inlined_call_operand.hbm [shape: f32[8,128], index: 9, kind: output, shape index: {}]  }
   0x1   :  { %15 = vsyncpa [#allocation6], 0 }
   0x2   :  { %16 = vsyncpa [#allocation9], 0 }
   0x3   :  { %17 = vsyncpa [#allocation4], 0  ;;  %s1952_s30 = smov [#allocation5]   ;;  %s1812_s13 = scalar_lea.hbm %s2149_s1, 27648 }
   0x4   :  { %s33_s10 = sshll.u32 %s1952_s30, 4  ;;  %p1813_p0 = scmp.ne.s32.totalorder %s2149_s1, %s1812_s13  ;;  %s34_s10 = int_to_ptr.vmem [resolvable:$true] %s33_s10 }
   0x5   :  { %p1816_p1 = scmp.lt.u32.totalorder %s1812_s13, %s2149_s1 }
   0x7   :  { %p1818_p2 = pnand %p1816_p1, %p1813_p0 }
   0x9   :  { %1821 = shalt.err (!%p1818_p2)
}
   0xa   :  { %s1822_s18 = scalar_lea.vmem %s34_s10, 27648  ;;  %p1827_p4 = scmp.lt.s32.totalorder %s34_s10, %s34_s10 }
   0xb   :  { %p1823_p3 = scmp.ne.s32.totalorder %s34_s10, %s1822_s18  ;;  %p1828_p5 = scmp.lt.s32.totalorder %s1822_s18, %s1822_s18 }
   0xd   :  { %p1829_p6 = por %p1828_p5, %p1827_p4 }
   0xf   :  { %p1830_p7 = pnand %p1829_p6, %p1823_p3 }
  0x11   :  { %1833 = shalt.err (!%p1830_p7)
}
  0x12   :  { %s1953_s19 = smov 128   ;;  %s1954_s20 = smov 8  }
  0x13   :  { %39 = dma.hbm_to_vmem [thread:$0]  %s2149_s1, 27648, %s34_s10, [#allocation6], %s1953_s19, %s1953_s19, %s1954_s20  }
  0x14   :  { %s1955_s23 = smov [#allocation8]   ;;  %s1956_s25 = smov [#allocation2]  }
  0x15   :  { %s61_s24 = sshll.u32 %s1955_s23, 4  ;;  %s24_s26 = sshll.u32 %s1956_s25, 4  ;;  %s62_s24 = int_to_ptr.vmem [resolvable:$true] %s61_s24  ;;  %s25_s26 = int_to_ptr.vmem [resolvable:$true] %s24_s26 }
  0x16   :  { %s1834_s29 = scalar_lea.hbm %s2153_s5, 2048 }
  0x17   :  { %p1835_p8 = scmp.ne.s32.totalorder %s2153_s5, %s1834_s29  ;;  %p1838_p9 = scmp.lt.u32.totalorder %s1834_s29, %s2153_s5 }
  0x19   :  { %p1840_p10 = pnand %p1838_p9, %p1835_p8 }
  0x1b   :  { %1843 = shalt.err (!%p1840_p10)
}
  0x1c   :  { %s1844_s1 = scalar_lea.vmem %s62_s24, 2048  ;;  %p1849_p12 = scmp.lt.s32.totalorder %s62_s24, %s62_s24 }
  0x1d   :  { %p1845_p11 = scmp.ne.s32.totalorder %s62_s24, %s1844_s1  ;;  %p1850_p13 = scmp.lt.s32.totalorder %s1844_s1, %s1844_s1 }
  0x1f   :  { %p1851_p0 = por %p1850_p13, %p1849_p12 }
  0x21   :  { %p1852_p1 = pnand %p1851_p0, %p1845_p11 }
  0x23   :  { %1855 = shalt.err (!%p1852_p1)
}
  0x24   :  { %67 = dma.hbm_to_vmem [thread:$0]  %s2153_s5, 2048, %s62_s24, [#allocation9], %s1953_s19, %s1953_s19, %s1954_s20  }
  0x25   :  { %s1856_s17 = scalar_lea.hbm %s2148_s0, 1792 }
  0x26   :  { %p1857_p2 = scmp.ne.s32.totalorder %s2148_s0, %s1856_s17  ;;  %p1860_p3 = scmp.lt.u32.totalorder %s1856_s17, %s2148_s0 }
  0x28   :  { %p1862_p4 = pnand %p1860_p3, %p1857_p2 }
  0x2a   :  { %1865 = shalt.err (!%p1862_p4)
}
  0x2b   :  { %s1866_s25 = scalar_lea.vmem %s25_s26, 1792  ;;  %p1871_p6 = scmp.lt.s32.totalorder %s25_s26, %s25_s26 }
  0x2c   :  { %p1867_p5 = scmp.ne.s32.totalorder %s25_s26, %s1866_s25  ;;  %p1872_p7 = scmp.lt.s32.totalorder %s1866_s25, %s1866_s25 }
  0x2e   :  { %p1873_p8 = por %p1872_p7, %p1871_p6 }
  0x30   :  { %p1874_p9 = pnand %p1873_p8, %p1867_p5 }
  0x32   :  { %1877 = shalt.err (!%p1874_p9)
}
  0x33   :  { %27 = dma.hbm_to_vmem [thread:$0]  %s2148_s0, 1792, %s25_s26, [#allocation3]  }
  0x34   :  { %s1957_s27 = smov [#allocation7]   ;;  %s1958_s29 = smov [#allocation10]  }
  0x35   :  { %s47_s28 = sshll.u32 %s1957_s27, 4  ;;  %s75_s30 = sshll.u32 %s1958_s29, 4  ;;  %s48_s28 = int_to_ptr.vmem [resolvable:$true] %s47_s28  ;;  %s76_s30 = int_to_ptr.vmem [resolvable:$true] %s75_s30 }
  0x36   :  { %s1878_s13 = scalar_lea.hbm %s2151_s3, 2048 }
  0x37   :  { %p1879_p10 = scmp.ne.s32.totalorder %s2151_s3, %s1878_s13  ;;  %p1882_p11 = scmp.lt.u32.totalorder %s1878_s13, %s2151_s3 }
  0x39   :  { %p1884_p12 = pnand %p1882_p11, %p1879_p10 }
  0x3b   :  { %1887 = shalt.err (!%p1884_p12)
}
  0x3c   :  { %s1888_s0 = scalar_lea.vmem %s48_s28, 2048  ;;  %p1893_p0 = scmp.lt.s32.totalorder %s48_s28, %s48_s28 }
  0x3d   :  { %p1889_p13 = scmp.ne.s32.totalorder %s48_s28, %s1888_s0  ;;  %p1894_p1 = scmp.lt.s32.totalorder %s1888_s0, %s1888_s0 }
  0x3f   :  { %p1895_p2 = por %p1894_p1, %p1893_p0 }
  0x41   :  { %p1896_p3 = pnand %p1895_p2, %p1889_p13 }
  0x43   :  { %1899 = shalt.err (!%p1896_p3)
}
  0x44   :  { %53 = dma.hbm_to_vmem [thread:$0]  %s2151_s3, 2048, %s48_s28, [#allocation6], %s1953_s19, %s1953_s19, %s1954_s20  }
  0x45   :  { %s1900_s21 = scalar_lea.hbm %s2155_s7, 2048 }
  0x46   :  { %p1901_p4 = scmp.ne.s32.totalorder %s2155_s7, %s1900_s21  ;;  %p1904_p5 = scmp.lt.u32.totalorder %s1900_s21, %s2155_s7 }
  0x48   :  { %p1906_p6 = pnand %p1904_p5, %p1901_p4 }
  0x4a   :  { %1909 = shalt.err (!%p1906_p6)
}
  0x4b   :  { %s1910_s24 = scalar_lea.vmem %s76_s30, 2048  ;;  %p1915_p8 = scmp.lt.s32.totalorder %s76_s30, %s76_s30 }
  0x4c   :  { %p1911_p7 = scmp.ne.s32.totalorder %s76_s30, %s1910_s24  ;;  %p1916_p9 = scmp.lt.s32.totalorder %s1910_s24, %s1910_s24 }
  0x4e   :  { %p1917_p10 = por %p1916_p9, %p1915_p8 }
  0x50   :  { %p1918_p11 = pnand %p1917_p10, %p1911_p7 }
  0x52   :  { %1921 = shalt.err (!%p1918_p11)
}
  0x53   :  { %81 = dma.hbm_to_vmem [thread:$0]  %s2155_s7, 2048, %s76_s30, [#allocation9], %s1953_s19, %s1953_s19, %s1954_s20  }
  0x54   :  { %1944 = dma.done.wait [#allocation3], 1792  }
  0x55   :  { %1945 = vsyncadd [#allocation3], 4294965504 }
  0x56   :  { %1946 = dma.done.wait [#allocation6], 29696  }
  0x57   :  { %1947 = vsyncadd [#allocation6], 4294937600 }
  0x58   :  { %1948 = dma.done.wait [#allocation9], 4096  }
  0x59   :  { %1949 = vsyncadd [#allocation9], 4294963200  ;;  %v129_v0 = vld [vmem:[#allocation5 + $0x80] sm:$0xff]  ;;  %v130_v1 = vld [vmem:[#allocation5 + $0x88] sm:$0xff]  ;;  %vm336_vm0 = vcmask 523264   ;;  %vm1960_vm1 = vmmov 0  }
  0x5a   :  { %v113_v2 = vld [vmem:[#allocation5] sm:$0xff]  ;;  %v1501_v3 = vpack.c.bf16 %v130_v1, %v129_v0  ;;  %v114_v4 = vld [vmem:[#allocation5 + $0x8] sm:$0xff]  ;;  %v131_v11 = vld [vmem:[#allocation5 + $0x90] sm:$0xff]  ;;  %s1962_s11 = smov [#allocation11]  }
  0x5b   :  { %v161_v5 = vld [vmem:[#allocation5 + $0x180] sm:$0xff]  ;;  %v162_v6 = vld [vmem:[#allocation5 + $0x188] sm:$0xff]  ;;  %v1503_v7 = vpack.c.bf16 %v114_v4, %v113_v2  ;;  %v132_v13 = vld [vmem:[#allocation5 + $0x98] sm:$0xff]  ;;  %s1119_s12 = sshll.u32 %s1962_s11, 4  ;;  %s1120_s12 = int_to_ptr.vmem [resolvable:$true] %s1119_s12 }
  0x5c   :  { %v1533_v8 = vpack.c.bf16 %v162_v6, %v161_v5  ;;  %v145_v9 = vld [vmem:[#allocation5 + $0x100] sm:$0xff]  ;;  %v146_v10 = vld [vmem:[#allocation5 + $0x108] sm:$0xff]  ;;  %1502 = vmatprep.subr.bf16.mxu0 %v1501_v3  ;;  %v115_v14 = vld [vmem:[#allocation5 + $0x10] sm:$0xff]  ;;  %v1505_v16 = vpack.c.bf16 %v132_v13, %v131_v11  ;;  %s1922_s13 = scalar_lea.vmem %s1120_s12, 128  ;;  %p1927_p13 = scmp.lt.s32.totalorder %s1120_s12, %s1120_s12 }
  0x5d   :  { %v1535_v12 = vpack.c.bf16 %v146_v10, %v145_v9  ;;  %v116_v15 = vld [vmem:[#allocation5 + $0x18] sm:$0xff]  ;;  %1504 = vmatpush3.bf16.msra.mxu0 %v1503_v7  ;;  %v163_v18 = vld [vmem:[#allocation5 + $0x190] sm:$0xff]  ;;  %v133_v23 = vld [vmem:[#allocation5 + $0xa0] sm:$0xff]  ;;  %p1923_p12 = scmp.ne.s32.totalorder %s1120_s12, %s1922_s13  ;;  %p1928_p0 = scmp.lt.s32.totalorder %s1922_s13, %s1922_s13 }
  0x5e   :  { %1534 = vmatprep.subr.bf16.mxu1 %v1533_v8  ;;  %v1507_v17 = vpack.c.bf16 %v116_v15, %v115_v14  ;;  %v164_v19 = vld [vmem:[#allocation5 + $0x198] sm:$0xff]  ;;  %v147_v20 = vld [vmem:[#allocation5 + $0x110] sm:$0xff]  ;;  %v134_v24 = vld [vmem:[#allocation5 + $0xa8] sm:$0xff]  ;;  %1506 = vmatprep.subr.bf16.mxu0 %v1505_v16 }
  0x5f   :  { %1536 = vmatpush3.bf16.msra.mxu1 %v1535_v12  ;;  %v1537_v21 = vpack.c.bf16 %v164_v19, %v163_v18  ;;  %v148_v22 = vld [vmem:[#allocation5 + $0x118] sm:$0xff]  ;;  %v1509_v26 = vpack.c.bf16 %v134_v24, %v133_v23  ;;  %v117_v27 = vld [vmem:[#allocation5 + $0x20] sm:$0xff]  ;;  %v118_v28 = vld [vmem:[#allocation5 + $0x28] sm:$0xff]  ;;  %p1929_p1 = por %p1928_p0, %p1927_p13 }
  0x60   :  { %v1539_v25 = vpack.c.bf16 %v148_v22, %v147_v20  ;;  %v165_v29 = vld [vmem:[#allocation5 + $0x1a0] sm:$0xff]  ;;  %v166_v30 = vld [vmem:[#allocation5 + $0x1a8] sm:$0xff]  ;;  %v1511_v33 = vpack.c.bf16 %v118_v28, %v117_v27  ;;  %v135_v35 = vld [vmem:[#allocation5 + $0xb0] sm:$0xff] }
  0x61   :  { %1538 = vmatprep.subr.bf16.mxu1 %v1537_v21  ;;  %v149_v31 = vld [vmem:[#allocation5 + $0x120] sm:$0xff]  ;;  %v150_v32 = vld [vmem:[#allocation5 + $0x128] sm:$0xff]  ;;  %1508 = vmatpush3.bf16.msra.mxu0 %v1507_v17  ;;  %v1541_v34 = vpack.c.bf16 %v166_v30, %v165_v29  ;;  %v136_v36 = vld [vmem:[#allocation5 + $0xb8] sm:$0xff]  ;;  %p1930_p2 = pnand %p1929_p1, %p1923_p12 }
  0x62   :  { %v119_v37 = vld [vmem:[#allocation5 + $0x30] sm:$0xff]  ;;  %1510 = vmatprep.subr.bf16.mxu0 %v1509_v26  ;;  %v1543_v38 = vpack.c.bf16 %v150_v32, %v149_v31  ;;  %v1513_v39 = vpack.c.bf16 %v136_v36, %v135_v35  ;;  %v120_v40 = vld [vmem:[#allocation5 + $0x38] sm:$0xff]  ;;  %v137_v46 = vld [vmem:[#allocation5 + $0xc0] sm:$0xff] }
  0x63   :  { %1540 = vmatpush3.bf16.msra.mxu1 %v1539_v25  ;;  %v167_v41 = vld [vmem:[#allocation5 + $0x1b0] sm:$0xff]  ;;  %v168_v42 = vld [vmem:[#allocation5 + $0x1b8] sm:$0xff]  ;;  %v138_v47 = vld [vmem:[#allocation5 + $0xc8] sm:$0xff]  ;;  %v1515_v48 = vpack.c.bf16 %v120_v40, %v119_v37 }
  0x64   :  { %1542 = vmatprep.subr.bf16.mxu1 %v1541_v34  ;;  %v1545_v43 = vpack.c.bf16 %v168_v42, %v167_v41  ;;  %v151_v44 = vld [vmem:[#allocation5 + $0x130] sm:$0xff]  ;;  %v152_v45 = vld [vmem:[#allocation5 + $0x138] sm:$0xff]  ;;  %v169_v49 = vld [vmem:[#allocation5 + $0x1c0] sm:$0xff]  ;;  %v1517_v52 = vpack.c.bf16 %v138_v47, %v137_v46 }
  0x65   :  { %1512 = vmatpush3.bf16.msra.mxu0 %v1511_v33  ;;  %v170_v50 = vld [vmem:[#allocation5 + $0x1c8] sm:$0xff]  ;;  %v1547_v51 = vpack.c.bf16 %v152_v45, %v151_v44  ;;  %v121_v53 = vld [vmem:[#allocation5 + $0x40] sm:$0xff]  ;;  %v139_v58 = vld [vmem:[#allocation5 + $0xd0] sm:$0xff] }
  0x66   :  { %1514 = vmatprep.subr.bf16.mxu0 %v1513_v39  ;;  %v122_v54 = vld [vmem:[#allocation5 + $0x48] sm:$0xff]  ;;  %v153_v55 = vld [vmem:[#allocation5 + $0x140] sm:$0xff]  ;;  %v1549_v56 = vpack.c.bf16 %v170_v50, %v169_v49  ;;  %v140_v59 = vld [vmem:[#allocation5 + $0xd8] sm:$0xff] }
  0x67   :  { %1544 = vmatpush3.bf16.msra.mxu1 %v1543_v38  ;;  %v154_v57 = vld [vmem:[#allocation5 + $0x148] sm:$0xff]  ;;  %v171_v60 = vld [vmem:[#allocation5 + $0x1d0] sm:$0xff]  ;;  %v172_v61 = vld [vmem:[#allocation5 + $0x1d8] sm:$0xff]  ;;  %v1519_v62 = vpack.c.bf16 %v122_v54, %v121_v53  ;;  %v1521_v0 = vpack.c.bf16 %v140_v59, %v139_v58 }
  0x68   :  { %1546 = vmatprep.subr.bf16.mxu1 %v1545_v43  ;;  %v1551_v63 = vpack.c.bf16 %v154_v57, %v153_v55  ;;  %v123_v1 = vld [vmem:[#allocation5 + $0x50] sm:$0xff]  ;;  %v124_v2 = vld [vmem:[#allocation5 + $0x58] sm:$0xff]  ;;  %v1553_v4 = vpack.c.bf16 %v172_v61, %v171_v60  ;;  %v141_v6 = vld [vmem:[#allocation5 + $0xe0] sm:$0xff] }
  0x69   :  { %1516 = vmatpush3.bf16.msra.mxu0 %v1515_v48  ;;  %v155_v3 = vld [vmem:[#allocation5 + $0x150] sm:$0xff]  ;;  %v156_v5 = vld [vmem:[#allocation5 + $0x158] sm:$0xff]  ;;  %v142_v7 = vld [vmem:[#allocation5 + $0xe8] sm:$0xff]  ;;  %v1523_v10 = vpack.c.bf16 %v124_v2, %v123_v1 }
  0x6a   :  { %1518 = vmatprep.subr.bf16.mxu0 %v1517_v52  ;;  %v173_v8 = vld [vmem:[#allocation5 + $0x1e0] sm:$0xff]  ;;  %v174_v9 = vld [vmem:[#allocation5 + $0x1e8] sm:$0xff]  ;;  %v100_v12 = vld [vmem:[#allocation2 + $0x8] sm:$0xff]  ;;  %v1555_v13 = vpack.c.bf16 %v156_v5, %v155_v3  ;;  %v1525_v14 = vpack.c.bf16 %v142_v7, %v141_v6 }
  0x6b   :  { %1548 = vmatpush3.bf16.msra.mxu1 %v1547_v51  ;;  %v125_v11 = vld [vmem:[#allocation5 + $0x60] sm:$0xff]  ;;  %v126_v15 = vld [vmem:[#allocation5 + $0x68] sm:$0xff]  ;;  %v1557_v18 = vpack.c.bf16 %v174_v9, %v173_v8  ;;  %v143_v19 = vld [vmem:[#allocation5 + $0xf0] sm:$0xff]  ;;  %404 = vmatprep.mubr.f32.mxu0 %v100_v12 }
  0x6c   :  { %1550 = vmatprep.subr.bf16.mxu1 %v1549_v56  ;;  %v157_v16 = vld [vmem:[#allocation5 + $0x160] sm:$0xff]  ;;  %v158_v17 = vld [vmem:[#allocation5 + $0x168] sm:$0xff]  ;;  %v144_v20 = vld [vmem:[#allocation5 + $0xf8] sm:$0xff]  ;;  %v1527_v24 = vpack.c.bf16 %v126_v15, %v125_v11 }
  0x6d   :  { %1520 = vmatpush3.bf16.msra.mxu0 %v1519_v62  ;;  %v102_v21 = vld [vmem:[#allocation2 + $0x18] sm:$0xff]  ;;  %v175_v22 = vld [vmem:[#allocation5 + $0x1f0] sm:$0xff]  ;;  %v176_v23 = vld [vmem:[#allocation5 + $0x1f8] sm:$0xff]  ;;  %v1559_v25 = vpack.c.bf16 %v158_v17, %v157_v16  ;;  %v1529_v26 = vpack.c.bf16 %v144_v20, %v143_v19 }
  0x6e   :  { %1522 = vmatprep.subr.bf16.mxu0 %v1521_v0  ;;  %474 = vmatprep.mubr.f32.mxu1 %v102_v21  ;;  %v127_v27 = vld [vmem:[#allocation5 + $0x70] sm:$0xff]  ;;  %v128_v28 = vld [vmem:[#allocation5 + $0x78] sm:$0xff]  ;;  %v1561_v30 = vpack.c.bf16 %v176_v23, %v175_v22  ;;  %v193_v32 = vld [vmem:[#allocation5 + $0x280] sm:$0xff] }
  0x6f   :  { %1552 = vmatpush3.bf16.msra.mxu1 %v1551_v63  ;;  %v159_v29 = vld [vmem:[#allocation5 + $0x170] sm:$0xff]  ;;  %v160_v31 = vld [vmem:[#allocation5 + $0x178] sm:$0xff]  ;;  %v194_v33 = vld [vmem:[#allocation5 + $0x288] sm:$0xff]  ;;  %v1531_v36 = vpack.c.bf16 %v128_v28, %v127_v27 }
  0x70   :  { %1554 = vmatprep.subr.bf16.mxu1 %v1553_v4  ;;  %v225_v34 = vld [vmem:[#allocation5 + $0x380] sm:$0xff]  ;;  %v226_v35 = vld [vmem:[#allocation5 + $0x388] sm:$0xff]  ;;  %v1563_v37 = vpack.c.bf16 %v160_v31, %v159_v29  ;;  %v1565_v38 = vpack.c.bf16 %v194_v33, %v193_v32  ;;  %v195_v44 = vld [vmem:[#allocation5 + $0x290] sm:$0xff] }
  0x71   :  { %1524 = vmatpush3.bf16.msra.mxu0 %v1523_v10  ;;  %v177_v39 = vld [vmem:[#allocation5 + $0x200] sm:$0xff]  ;;  %v178_v40 = vld [vmem:[#allocation5 + $0x208] sm:$0xff]  ;;  %v1597_v42 = vpack.c.bf16 %v226_v35, %v225_v34  ;;  %v196_v45 = vld [vmem:[#allocation5 + $0x298] sm:$0xff] }
  0x72   :  { %1526 = vmatprep.subr.bf16.mxu0 %v1525_v14  ;;  %v209_v41 = vld [vmem:[#allocation5 + $0x300] sm:$0xff]  ;;  %v210_v43 = vld [vmem:[#allocation5 + $0x308] sm:$0xff]  ;;  %v227_v46 = vld [vmem:[#allocation5 + $0x390] sm:$0xff]  ;;  %v1567_v49 = vpack.c.bf16 %v178_v40, %v177_v39  ;;  %v1569_v52 = vpack.c.bf16 %v196_v45, %v195_v44 }
  0x73   :  { %1556 = vmatpush3.bf16.msra.mxu1 %v1555_v13  ;;  %v228_v47 = vld [vmem:[#allocation5 + $0x398] sm:$0xff]  ;;  %v99_v48 = vld [vmem:[#allocation2] sm:$0xff]  ;;  %v101_v50 = vld [vmem:[#allocation2 + $0x10] sm:$0xff]  ;;  %v1599_v51 = vpack.c.bf16 %v210_v43, %v209_v41 }
  0x74   :  { %1558 = vmatprep.subr.bf16.mxu1 %v1557_v18  ;;  %v179_v53 = vld [vmem:[#allocation5 + $0x210] sm:$0xff]  ;;  %v180_v54 = vld [vmem:[#allocation5 + $0x218] sm:$0xff]  ;;  %v1601_v56 = vpack.c.bf16 %v228_v47, %v227_v46  ;;  %v197_v58 = vld [vmem:[#allocation5 + $0x2a0] sm:$0xff] }
  0x75   :  { %1528 = vmatpush3.bf16.msra.mxu0 %v1527_v24  ;;  %v211_v55 = vld [vmem:[#allocation5 + $0x310] sm:$0xff]  ;;  %v212_v57 = vld [vmem:[#allocation5 + $0x318] sm:$0xff]  ;;  %v198_v59 = vld [vmem:[#allocation5 + $0x2a8] sm:$0xff]  ;;  %v1571_v62 = vpack.c.bf16 %v180_v54, %v179_v53 }
  0x76   :  { %1530 = vmatprep.subr.bf16.mxu0 %v1529_v26  ;;  %v229_v60 = vld [vmem:[#allocation5 + $0x3a0] sm:$0xff]  ;;  %v230_v61 = vld [vmem:[#allocation5 + $0x3a8] sm:$0xff]  ;;  %v1603_v63 = vpack.c.bf16 %v212_v57, %v211_v55  ;;  %v1573_v0 = vpack.c.bf16 %v198_v59, %v197_v58  ;;  %v199_v6 = vld [vmem:[#allocation5 + $0x2b0] sm:$0xff] }
  0x77   :  { %1560 = vmatpush3.bf16.msra.mxu1 %v1559_v25  ;;  %v181_v1 = vld [vmem:[#allocation5 + $0x220] sm:$0xff]  ;;  %v182_v2 = vld [vmem:[#allocation5 + $0x228] sm:$0xff]  ;;  %v1605_v4 = vpack.c.bf16 %v230_v61, %v229_v60  ;;  %v200_v7 = vld [vmem:[#allocation5 + $0x2b8] sm:$0xff] }
  0x78   :  { %1562 = vmatprep.subr.bf16.mxu1 %v1561_v30  ;;  %v213_v3 = vld [vmem:[#allocation5 + $0x320] sm:$0xff]  ;;  %v214_v5 = vld [vmem:[#allocation5 + $0x328] sm:$0xff]  ;;  %v231_v8 = vld [vmem:[#allocation5 + $0x3b0] sm:$0xff]  ;;  %v1575_v10 = vpack.c.bf16 %v182_v2, %v181_v1  ;;  %v1577_v12 = vpack.c.bf16 %v200_v7, %v199_v6 }
  0x79   :  { %1532 = vmatpush3.bf16.msra.mxu0 %v1531_v36  ;;  %v232_v9 = vld [vmem:[#allocation5 + $0x3b8] sm:$0xff]  ;;  %v1607_v11 = vpack.c.bf16 %v214_v5, %v213_v3  ;;  %v183_v13 = vld [vmem:[#allocation5 + $0x230] sm:$0xff]  ;;  %v201_v18 = vld [vmem:[#allocation5 + $0x2c0] sm:$0xff] }
  0x7a   :  { %1566 = vmatprep.subr.bf16.mxu0 %v1565_v38  ;;  %v184_v14 = vld [vmem:[#allocation5 + $0x238] sm:$0xff]  ;;  %v215_v15 = vld [vmem:[#allocation5 + $0x330] sm:$0xff]  ;;  %v1609_v16 = vpack.c.bf16 %v232_v9, %v231_v8  ;;  %v202_v19 = vld [vmem:[#allocation5 + $0x2c8] sm:$0xff] }
  0x7b   :  { %1564 = vmatpush3.bf16.msra.mxu1 %v1563_v37  ;;  %v216_v17 = vld [vmem:[#allocation5 + $0x338] sm:$0xff]  ;;  %v233_v20 = vld [vmem:[#allocation5 + $0x3c0] sm:$0xff]  ;;  %v234_v21 = vld [vmem:[#allocation5 + $0x3c8] sm:$0xff]  ;;  %v1579_v23 = vpack.c.bf16 %v184_v14, %v183_v13  ;;  %v1581_v26 = vpack.c.bf16 %v202_v19, %v201_v18 }
  0x7c   :  { %1598 = vmatprep.subr.bf16.mxu1 %v1597_v42  ;;  %405 = vmatmul.mubr.f32.vlgmr.msra.gmra.mrb[0].mxu0 %v99_v48  ;;  %v104_v22 = vld [vmem:[#allocation2 + $0x28] sm:$0xff]  ;;  %v185_v24 = vld [vmem:[#allocation5 + $0x240] sm:$0xff]  ;;  %v1611_v25 = vpack.c.bf16 %v216_v17, %v215_v15  ;;  %v186_v27 = vld [vmem:[#allocation5 + $0x248] sm:$0xff]  ;;  %v1613_v30 = vpack.c.bf16 %v234_v21, %v233_v20 }
  0x7d   :  { %1568 = vmatpush3.bf16.msra.mxu0 %v1567_v49  ;;  %544 = vmatprep.mubr.f32.mxu0 %v104_v22  ;;  %v217_v28 = vld [vmem:[#allocation5 + $0x340] sm:$0xff]  ;;  %v106_v29 = vld [vmem:[#allocation2 + $0x38] sm:$0xff]  ;;  %v203_v32 = vld [vmem:[#allocation5 + $0x2d0] sm:$0xff]  ;;  %v1583_v36 = vpack.c.bf16 %v186_v27, %v185_v24 }
  0x7e   :  { %475 = vmatmul.mubr.f32.vlgmr.msra.gmra.mrb[0].mxu1 %v101_v50  ;;  %1570 = vmatprep.subr.bf16.mxu0 %v1569_v52  ;;  %v218_v31 = vld [vmem:[#allocation5 + $0x348] sm:$0xff]  ;;  %v204_v33 = vld [vmem:[#allocation5 + $0x2d8] sm:$0xff]  ;;  %v235_v34 = vld [vmem:[#allocation5 + $0x3d0] sm:$0xff] }
  0x7f   :  { %1600 = vmatpush3.bf16.msra.mxu1 %v1599_v51  ;;  %614 = vmatprep.mubr.f32.mxu1 %v106_v29  ;;  %v236_v35 = vld [vmem:[#allocation5 + $0x3d8] sm:$0xff]  ;;  %v1615_v37 = vpack.c.bf16 %v218_v31, %v217_v28  ;;  %v1585_v38 = vpack.c.bf16 %v204_v33, %v203_v32  ;;  %v187_v39 = vld [vmem:[#allocation5 + $0x250] sm:$0xff]  ;;  %v205_v44 = vld [vmem:[#allocation5 + $0x2e0] sm:$0xff] }
  0x80   :  { %1602 = vmatprep.subr.bf16.mxu1 %v1601_v56  ;;  %v188_v40 = vld [vmem:[#allocation5 + $0x258] sm:$0xff]  ;;  %v219_v41 = vld [vmem:[#allocation5 + $0x350] sm:$0xff]  ;;  %v1617_v42 = vpack.c.bf16 %v236_v35, %v235_v34  ;;  %v206_v45 = vld [vmem:[#allocation5 + $0x2e8] sm:$0xff] }
  0x81   :  { %1572 = vmatpush3.bf16.msra.mxu0 %v1571_v62  ;;  %v220_v43 = vld [vmem:[#allocation5 + $0x358] sm:$0xff]  ;;  %v237_v46 = vld [vmem:[#allocation5 + $0x3e0] sm:$0xff]  ;;  %v238_v47 = vld [vmem:[#allocation5 + $0x3e8] sm:$0xff]  ;;  %v1587_v48 = vpack.c.bf16 %v188_v40, %v187_v39  ;;  %v1589_v50 = vpack.c.bf16 %v206_v45, %v205_v44 }
  0x82   :  { %1574 = vmatprep.subr.bf16.mxu0 %v1573_v0  ;;  %v1619_v49 = vpack.c.bf16 %v220_v43, %v219_v41  ;;  %v189_v51 = vld [vmem:[#allocation5 + $0x260] sm:$0xff]  ;;  %v190_v52 = vld [vmem:[#allocation5 + $0x268] sm:$0xff]  ;;  %v1621_v54 = vpack.c.bf16 %v238_v47, %v237_v46  ;;  %v207_v56 = vld [vmem:[#allocation5 + $0x2f0] sm:$0xff] }
  0x83   :  { %1604 = vmatpush3.bf16.msra.mxu1 %v1603_v63  ;;  %v221_v53 = vld [vmem:[#allocation5 + $0x360] sm:$0xff]  ;;  %v222_v55 = vld [vmem:[#allocation5 + $0x368] sm:$0xff]  ;;  %v208_v57 = vld [vmem:[#allocation5 + $0x2f8] sm:$0xff]  ;;  %v1591_v60 = vpack.c.bf16 %v190_v52, %v189_v51 }
  0x84   :  { %1606 = vmatprep.subr.bf16.mxu1 %v1605_v4  ;;  %v239_v58 = vld [vmem:[#allocation5 + $0x3f0] sm:$0xff]  ;;  %v240_v59 = vld [vmem:[#allocation5 + $0x3f8] sm:$0xff]  ;;  %v1623_v61 = vpack.c.bf16 %v222_v55, %v221_v53  ;;  %v1593_v62 = vpack.c.bf16 %v208_v57, %v207_v56  ;;  %v257_v4 = vld [vmem:[#allocation5 + $0x480] sm:$0xff] }
  0x85   :  { %1576 = vmatpush3.bf16.msra.mxu0 %v1575_v10  ;;  %v191_v63 = vld [vmem:[#allocation5 + $0x270] sm:$0xff]  ;;  %v192_v0 = vld [vmem:[#allocation5 + $0x278] sm:$0xff]  ;;  %v1625_v2 = vpack.c.bf16 %v240_v59, %v239_v58  ;;  %v258_v5 = vld [vmem:[#allocation5 + $0x488] sm:$0xff] }
  0x86   :  { %1578 = vmatprep.subr.bf16.mxu0 %v1577_v12  ;;  %v223_v1 = vld [vmem:[#allocation5 + $0x370] sm:$0xff]  ;;  %v224_v3 = vld [vmem:[#allocation5 + $0x378] sm:$0xff]  ;;  %v289_v6 = vld [vmem:[#allocation5 + $0x580] sm:$0xff]  ;;  %v1595_v8 = vpack.c.bf16 %v192_v0, %v191_v63  ;;  %v1629_v10 = vpack.c.bf16 %v258_v5, %v257_v4 }
  0x87   :  { %1608 = vmatpush3.bf16.msra.mxu1 %v1607_v11  ;;  %v290_v7 = vld [vmem:[#allocation5 + $0x588] sm:$0xff]  ;;  %v1627_v9 = vpack.c.bf16 %v224_v3, %v223_v1  ;;  %v241_v11 = vld [vmem:[#allocation5 + $0x400] sm:$0xff]  ;;  %v260_v17 = vld [vmem:[#allocation5 + $0x498] sm:$0xff] }
  0x88   :  { %1610 = vmatprep.subr.bf16.mxu1 %v1609_v16  ;;  %v242_v12 = vld [vmem:[#allocation5 + $0x408] sm:$0xff]  ;;  %v273_v13 = vld [vmem:[#allocation5 + $0x500] sm:$0xff]  ;;  %v1661_v14 = vpack.c.bf16 %v290_v7, %v289_v6  ;;  %v259_v16 = vld [vmem:[#allocation5 + $0x490] sm:$0xff] }
  0x89   :  { %1580 = vmatpush3.bf16.msra.mxu0 %v1579_v23  ;;  %v274_v15 = vld [vmem:[#allocation5 + $0x508] sm:$0xff]  ;;  %v291_v18 = vld [vmem:[#allocation5 + $0x590] sm:$0xff]  ;;  %v292_v19 = vld [vmem:[#allocation5 + $0x598] sm:$0xff]  ;;  %v1631_v21 = vpack.c.bf16 %v242_v12, %v241_v11  ;;  %v1633_v24 = vpack.c.bf16 %v260_v17, %v259_v16 }
  0x8a   :  { %1582 = vmatprep.subr.bf16.mxu0 %v1581_v26  ;;  %v103_v20 = vld [vmem:[#allocation2 + $0x20] sm:$0xff]  ;;  %v105_v22 = vld [vmem:[#allocation2 + $0x30] sm:$0xff]  ;;  %v1663_v23 = vpack.c.bf16 %v274_v15, %v273_v13  ;;  %v244_v26 = vld [vmem:[#allocation5 + $0x418] sm:$0xff]  ;;  %v1665_v28 = vpack.c.bf16 %v292_v19, %v291_v18 }
  0x8b   :  { %1612 = vmatpush3.bf16.msra.mxu1 %v1611_v25  ;;  %v243_v25 = vld [vmem:[#allocation5 + $0x410] sm:$0xff]  ;;  %v276_v29 = vld [vmem:[#allocation5 + $0x518] sm:$0xff]  ;;  %v262_v31 = vld [vmem:[#allocation5 + $0x4a8] sm:$0xff] }
  0x8c   :  { %1614 = vmatprep.subr.bf16.mxu1 %v1613_v30  ;;  %v275_v27 = vld [vmem:[#allocation5 + $0x510] sm:$0xff]  ;;  %v261_v30 = vld [vmem:[#allocation5 + $0x4a0] sm:$0xff]  ;;  %v294_v33 = vld [vmem:[#allocation5 + $0x5a8] sm:$0xff]  ;;  %v1635_v35 = vpack.c.bf16 %v244_v26, %v243_v25 }
  0x8d   :  { %1584 = vmatpush3.bf16.msra.mxu0 %v1583_v36  ;;  %v293_v32 = vld [vmem:[#allocation5 + $0x5a0] sm:$0xff]  ;;  %v108_v34 = vld [vmem:[#allocation2 + $0x48] sm:$0xff]  ;;  %v110_v36 = vld [vmem:[#allocation2 + $0x58] sm:$0xff] }
  0x8e   :  { %1586 = vmatprep.subr.bf16.mxu0 %v1585_v38  ;;  %v1637_v38 = vpack.c.bf16 %v262_v31, %v261_v30  ;;  %v245_v39 = vld [vmem:[#allocation5 + $0x420] sm:$0xff]  ;;  %v246_v40 = vld [vmem:[#allocation5 + $0x428] sm:$0xff]  ;;  %v263_v44 = vld [vmem:[#allocation5 + $0x4b0] sm:$0xff] }
  0x8f   :  { %1616 = vmatpush3.bf16.msra.mxu1 %v1615_v37  ;;  %v1667_v37 = vpack.c.bf16 %v276_v29, %v275_v27  ;;  %v277_v41 = vld [vmem:[#allocation5 + $0x520] sm:$0xff]  ;;  %v278_v43 = vld [vmem:[#allocation5 + $0x528] sm:$0xff]  ;;  %v264_v45 = vld [vmem:[#allocation5 + $0x4b8] sm:$0xff] }
  0x90   :  { %1618 = vmatprep.subr.bf16.mxu1 %v1617_v42  ;;  %v1669_v42 = vpack.c.bf16 %v294_v33, %v293_v32  ;;  %v295_v46 = vld [vmem:[#allocation5 + $0x5b0] sm:$0xff]  ;;  %v296_v47 = vld [vmem:[#allocation5 + $0x5b8] sm:$0xff]  ;;  %v265_v56 = vld [vmem:[#allocation5 + $0x4c0] sm:$0xff] }
  0x91   :  { %1588 = vmatpush3.bf16.msra.mxu0 %v1587_v48  ;;  %v1639_v48 = vpack.c.bf16 %v246_v40, %v245_v39  ;;  %v247_v51 = vld [vmem:[#allocation5 + $0x430] sm:$0xff]  ;;  %v248_v52 = vld [vmem:[#allocation5 + $0x438] sm:$0xff]  ;;  %v266_v57 = vld [vmem:[#allocation5 + $0x4c8] sm:$0xff] }
  0x92   :  { %1590 = vmatprep.subr.bf16.mxu0 %v1589_v50  ;;  %v1641_v50 = vpack.c.bf16 %v264_v45, %v263_v44  ;;  %v279_v53 = vld [vmem:[#allocation5 + $0x530] sm:$0xff]  ;;  %v280_v55 = vld [vmem:[#allocation5 + $0x538] sm:$0xff]  ;;  %v297_v58 = vld [vmem:[#allocation5 + $0x5c0] sm:$0xff] }
  0x93   :  { %1620 = vmatpush3.bf16.msra.mxu1 %v1619_v49  ;;  %v1671_v49 = vpack.c.bf16 %v278_v43, %v277_v41  ;;  %v298_v59 = vld [vmem:[#allocation5 + $0x5c8] sm:$0xff]  ;;  %v249_v63 = vld [vmem:[#allocation5 + $0x440] sm:$0xff]  ;;  %v267_v4 = vld [vmem:[#allocation5 + $0x4d0] sm:$0xff] }
  0x94   :  { %1622 = vmatprep.subr.bf16.mxu1 %v1621_v54  ;;  %v1673_v54 = vpack.c.bf16 %v296_v47, %v295_v46  ;;  %v250_v0 = vld [vmem:[#allocation5 + $0x448] sm:$0xff]  ;;  %v281_v1 = vld [vmem:[#allocation5 + $0x540] sm:$0xff]  ;;  %v268_v5 = vld [vmem:[#allocation5 + $0x4d8] sm:$0xff]  ;;  %v1959_v46 = vmov 0.0|0.0  }
  0x95   :  { %1592 = vmatpush3.bf16.msra.mxu0 %v1591_v60  ;;  %v1643_v60 = vpack.c.bf16 %v248_v52, %v247_v51  ;;  %v282_v3 = vld [vmem:[#allocation5 + $0x548] sm:$0xff]  ;;  %v299_v6 = vld [vmem:[#allocation5 + $0x5d0] sm:$0xff]  ;;  %v300_v7 = vld [vmem:[#allocation5 + $0x5d8] sm:$0xff] }
  0x96   :  { %1594 = vmatprep.subr.bf16.mxu0 %v1593_v62  ;;  %v1645_v62 = vpack.c.bf16 %v266_v57, %v265_v56  ;;  %v251_v11 = vld [vmem:[#allocation5 + $0x450] sm:$0xff]  ;;  %v252_v12 = vld [vmem:[#allocation5 + $0x458] sm:$0xff]  ;;  %v269_v16 = vld [vmem:[#allocation5 + $0x4e0] sm:$0xff] }
  0x97   :  { %1624 = vmatpush3.bf16.msra.mxu1 %v1623_v61  ;;  %v1675_v61 = vpack.c.bf16 %v280_v55, %v279_v53  ;;  %v283_v13 = vld [vmem:[#allocation5 + $0x550] sm:$0xff]  ;;  %v284_v15 = vld [vmem:[#allocation5 + $0x558] sm:$0xff]  ;;  %v270_v17 = vld [vmem:[#allocation5 + $0x4e8] sm:$0xff] }
  0x98   :  { %1626 = vmatprep.subr.bf16.mxu1 %v1625_v2  ;;  %v1677_v2 = vpack.c.bf16 %v298_v59, %v297_v58  ;;  %v301_v18 = vld [vmem:[#allocation5 + $0x5e0] sm:$0xff]  ;;  %v302_v19 = vld [vmem:[#allocation5 + $0x5e8] sm:$0xff]  ;;  %v272_v29 = vld [vmem:[#allocation5 + $0x4f8] sm:$0xff] }
  0x99   :  { %1596 = vmatpush3.bf16.msra.mxu0 %v1595_v8  ;;  %v1647_v8 = vpack.c.bf16 %v250_v0, %v249_v63  ;;  %v285_v25 = vld [vmem:[#allocation5 + $0x560] sm:$0xff]  ;;  %v1685_v26 = vpack.c.bf16 %v302_v19, %v301_v18  ;;  %v286_v27 = vld [vmem:[#allocation5 + $0x568] sm:$0xff]  ;;  %v303_v30 = vld [vmem:[#allocation5 + $0x5f0] sm:$0xff] }
  0x9a   :  { %1630 = vmatprep.subr.bf16.mxu0 %v1629_v10  ;;  %v1649_v10 = vpack.c.bf16 %v268_v5, %v267_v4  ;;  %v304_v31 = vld [vmem:[#allocation5 + $0x5f8] sm:$0xff]  ;;  %v1687_v33 = vpack.c.bf16 %v286_v27, %v285_v25  ;;  %v306_v43 = vld [vmem:[#allocation5 + $0x608] sm:$0xff]  ;;  %v107_v44 = vld [vmem:[#allocation2 + $0x40] sm:$0xff] }
  0x9b   :  { %1628 = vmatpush3.bf16.msra.mxu1 %v1627_v9  ;;  %v1679_v9 = vpack.c.bf16 %v282_v3, %v281_v1  ;;  %v288_v39 = vld [vmem:[#allocation5 + $0x578] sm:$0xff]  ;;  %v109_v47 = vld [vmem:[#allocation2 + $0x50] sm:$0xff]  ;;  %v310_v53 = vld [vmem:[#allocation5 + $0x628] sm:$0xff] }
  0x9c   :  { %1662 = vmatprep.subr.bf16.mxu1 %v1661_v14  ;;  %545 = vmatmul.mubr.f32.vlgmr.msra.gmra.mrb[2].mxu0 %v103_v20  ;;  %v1681_v14 = vpack.c.bf16 %v300_v7, %v299_v6  ;;  %v1651_v20 = vpack.c.bf16 %v252_v12, %v251_v11  ;;  %v309_v52 = vld [vmem:[#allocation5 + $0x620] sm:$0xff]  ;;  %v311_v55 = vld [vmem:[#allocation5 + $0x630] sm:$0xff]  ;;  %v312_v56 = vld [vmem:[#allocation5 + $0x638] sm:$0xff] }
  0x9d   :  { %1632 = vmatpush3.bf16.msra.mxu0 %v1631_v21  ;;  %684 = vmatprep.mubr.f32.mxu0 %v108_v34  ;;  %v1683_v21 = vpack.c.bf16 %v284_v15, %v283_v13  ;;  %v1703_v57 = vpack.c.bf16 %v312_v56, %v311_v55  ;;  %v313_v58 = vld [vmem:[#allocation5 + $0x640] sm:$0xff]  ;;  %v314_v59 = vld [vmem:[#allocation5 + $0x648] sm:$0xff]  ;;  %v319_v3 = vld [vmem:[#allocation5 + $0x670] sm:$0xff] }
  0x9e   :  { %615 = vmatmul.mubr.f32.vlgmr.msra.gmra.mrb[2].mxu1 %v105_v22  ;;  %1634 = vmatprep.subr.bf16.mxu0 %v1633_v24  ;;  %v1653_v22 = vpack.c.bf16 %v270_v17, %v269_v16  ;;  %v254_v24 = vld [vmem:[#allocation5 + $0x468] sm:$0xff]  ;;  %v317_v0 = vld [vmem:[#allocation5 + $0x660] sm:$0xff]  ;;  %v320_v4 = vld [vmem:[#allocation5 + $0x678] sm:$0xff] }
  0x9f   :  { %1664 = vmatpush3.bf16.msra.mxu1 %v1663_v23  ;;  %754 = vmatprep.mubr.f32.mxu1 %v110_v36  ;;  %v253_v23 = vld [vmem:[#allocation5 + $0x460] sm:$0xff]  ;;  %v256_v36 = vld [vmem:[#allocation5 + $0x478] sm:$0xff]  ;;  %v318_v1 = vld [vmem:[#allocation5 + $0x668] sm:$0xff]  ;;  %v1715_v5 = vpack.c.bf16 %v320_v4, %v319_v3 }
  0xa0   :  { %1666 = vmatprep.subr.bf16.mxu1 %v1665_v28  ;;  %v271_v28 = vld [vmem:[#allocation5 + $0x4f0] sm:$0xff]  ;;  %v1655_v32 = vpack.c.bf16 %v254_v24, %v253_v23  ;;  %v321_v6 = vld [vmem:[#allocation5 + $0x680] sm:$0xff]  ;;  %v322_v7 = vld [vmem:[#allocation5 + $0x688] sm:$0xff] }
  0xa1   :  { %1636 = vmatpush3.bf16.msra.mxu0 %v1635_v35  ;;  %v1657_v34 = vpack.c.bf16 %v272_v29, %v271_v28  ;;  %v255_v35 = vld [vmem:[#allocation5 + $0x470] sm:$0xff]  ;;  %v325_v12 = vld [vmem:[#allocation5 + $0x6a0] sm:$0xff]  ;;  %v326_v13 = vld [vmem:[#allocation5 + $0x6a8] sm:$0xff] }
  0xa2   :  { %1638 = vmatprep.subr.bf16.mxu0 %v1637_v38  ;;  %v287_v38 = vld [vmem:[#allocation5 + $0x570] sm:$0xff]  ;;  %v1659_v40 = vpack.c.bf16 %v256_v36, %v255_v35  ;;  %v328_v16 = vld [vmem:[#allocation5 + $0x6b8] sm:$0xff]  ;;  %v831_v19 = vld [vmem:[#allocation7] sm:$0xff] }
  0xa3   :  { %1668 = vmatpush3.bf16.msra.mxu1 %v1667_v37  ;;  %v1689_v37 = vpack.c.bf16 %v304_v31, %v303_v30  ;;  %v1691_v41 = vpack.c.bf16 %v288_v39, %v287_v38  ;;  %v327_v15 = vld [vmem:[#allocation5 + $0x6b0] sm:$0xff]  ;;  %v834_v23 = vld [vmem:[#allocation7 + $0x18] sm:$0xff]  ;;  %v835_v25 = vld [vmem:[#allocation7 + $0x20] sm:$0xff] }
  0xa4   :  { %1670 = vmatprep.subr.bf16.mxu1 %v1669_v42  ;;  %v305_v42 = vld [vmem:[#allocation5 + $0x600] sm:$0xff]  ;;  %v1727_v17 = vpack.c.bf16 %v328_v16, %v327_v15  ;;  %v111_v18 = vld [vmem:[#allocation2 + $0x60] sm:$0xff]  ;;  %v838_v29 = vld [vmem:[#allocation7 + $0x38] sm:$0xff] }
  0xa5   :  { %1640 = vmatpush3.bf16.msra.mxu0 %v1639_v48  ;;  %v1694_v45 = vpack.c.bf16 %v306_v43, %v305_v42  ;;  %v307_v48 = vld [vmem:[#allocation5 + $0x610] sm:$0xff]  ;;  %v839_v31 = vld [vmem:[#allocation7 + $0x40] sm:$0xff]  ;;  %v842_v35 = vld [vmem:[#allocation7 + $0x58] sm:$0xff]  ;;  %v1961_v43 = vmov 0.0  }
  0xa6   :  { %1642 = vmatprep.subr.bf16.mxu0 %v1641_v50  ;;  %v112_v50 = vld [vmem:[#allocation2 + $0x68] sm:$0xff]  ;;  %v837_v28 = vld [vmem:[#allocation7 + $0x30] sm:$0xff]  ;;  %v844_v38 = vld [vmem:[#allocation7 + $0x68] sm:$0xff] }
  0xa7   :  { %1672 = vmatpush3.bf16.msra.mxu1 %v1671_v49  ;;  %v308_v49 = vld [vmem:[#allocation5 + $0x618] sm:$0xff]  ;;  %v1739_v30 = vpack.c.bf16 %v838_v29, %v837_v28  ;;  %v929_v16 = vld [vmem:[#allocation8 + $0x20] sm:$0xff]  ;;  %v938_v29 = vld [vmem:[#allocation8 + $0x68] sm:$0xff] }
  0xa8   :  { %1674 = vmatprep.subr.bf16.mxu1 %v1673_v54  ;;  %v1697_v51 = vpack.c.bf16 %v308_v49, %v307_v48  ;;  %v1700_v54 = vpack.c.bf16 %v310_v53, %v309_v52  ;;  %v937_v28 = vld [vmem:[#allocation8 + $0x60] sm:$0xff] }
  0xa9   :  { %1644 = vmatpush3.bf16.msra.mxu0 %v1643_v60  ;;  %v1706_v60 = vpack.c.bf16 %v314_v59, %v313_v58 }
  0xaa   :  { %1646 = vmatprep.subr.bf16.mxu0 %v1645_v62  ;;  %v316_v62 = vld [vmem:[#allocation5 + $0x658] sm:$0xff] }
  0xab   :  { %1676 = vmatpush3.bf16.msra.mxu1 %v1675_v61  ;;  %v315_v61 = vld [vmem:[#allocation5 + $0x650] sm:$0xff] }
  0xac   :  { %1678 = vmatprep.subr.bf16.mxu1 %v1677_v2  ;;  %v1709_v63 = vpack.c.bf16 %v316_v62, %v315_v61  ;;  %v1712_v2 = vpack.c.bf16 %v318_v1, %v317_v0 }
  0xad   :  { %1648 = vmatpush3.bf16.msra.mxu0 %v1647_v8  ;;  %v1718_v8 = vpack.c.bf16 %v322_v7, %v321_v6  ;;  %v925_v6 = vld [vmem:[#allocation8] sm:$0xff]  ;;  %v926_v7 = vld [vmem:[#allocation8 + $0x8] sm:$0xff] }
  0xae   :  { %1650 = vmatprep.subr.bf16.mxu0 %v1649_v10  ;;  %v324_v10 = vld [vmem:[#allocation5 + $0x698] sm:$0xff] }
  0xaf   :  { %1680 = vmatpush3.bf16.msra.mxu1 %v1679_v9  ;;  %v323_v9 = vld [vmem:[#allocation5 + $0x690] sm:$0xff] }
  0xb0   :  { %1682 = vmatprep.subr.bf16.mxu1 %v1681_v14  ;;  %v1721_v11 = vpack.c.bf16 %v324_v10, %v323_v9  ;;  %v1724_v14 = vpack.c.bf16 %v326_v13, %v325_v12  ;;  %v927_v13 = vld [vmem:[#allocation8 + $0x10] sm:$0xff] }
  0xb1   :  { %1652 = vmatpush3.bf16.msra.mxu0 %v1651_v20  ;;  %v832_v20 = vld [vmem:[#allocation7 + $0x8] sm:$0xff] }
  0xb2   :  { %1654 = vmatprep.subr.bf16.mxu0 %v1653_v22  ;;  %v1730_v22 = vpack.c.bf16 %v832_v20, %v831_v19  ;;  %v931_v19 = vld [vmem:[#allocation8 + $0x30] sm:$0xff]  ;;  %v932_v20 = vld [vmem:[#allocation8 + $0x38] sm:$0xff] }
  0xb3   :  { %1684 = vmatpush3.bf16.msra.mxu1 %v1683_v21  ;;  %v833_v21 = vld [vmem:[#allocation7 + $0x10] sm:$0xff] }
  0xb4   :  { %1686 = vmatprep.subr.bf16.mxu1 %v1685_v26  ;;  %v1733_v24 = vpack.c.bf16 %v834_v23, %v833_v21  ;;  %v836_v26 = vld [vmem:[#allocation7 + $0x28] sm:$0xff]  ;;  %v1763_v21 = vpack.c.bf16 %v932_v20, %v931_v19 }
  0xb5   :  { %1656 = vmatpush3.bf16.msra.mxu0 %v1655_v32  ;;  %v1736_v27 = vpack.c.bf16 %v836_v26, %v835_v25  ;;  %v840_v32 = vld [vmem:[#allocation7 + $0x48] sm:$0xff]  ;;  %v935_v25 = vld [vmem:[#allocation8 + $0x50] sm:$0xff]  ;;  %v936_v26 = vld [vmem:[#allocation8 + $0x58] sm:$0xff] }
  0xb6   :  { %1658 = vmatprep.subr.bf16.mxu0 %v1657_v34  ;;  %v841_v34 = vld [vmem:[#allocation7 + $0x50] sm:$0xff]  ;;  %v934_v23 = vld [vmem:[#allocation8 + $0x48] sm:$0xff] }
  0xb7   :  { %1688 = vmatpush3.bf16.msra.mxu1 %v1687_v33  ;;  %v1742_v33 = vpack.c.bf16 %v840_v32, %v839_v31  ;;  %v1745_v36 = vpack.c.bf16 %v842_v35, %v841_v34  ;;  %v939_v31 = vld [vmem:[#allocation8 + $0x70] sm:$0xff]  ;;  %v940_v32 = vld [vmem:[#allocation8 + $0x78] sm:$0xff]  ;;  %v1019_v34 = vld [vmem:[#allocation10] sm:$0xff] }
  0xb8   :  { %1690 = vmatprep.subr.bf16.mxu1 %v1689_v37  ;;  %v843_v37 = vld [vmem:[#allocation7 + $0x60] sm:$0xff]  ;;  %v1020_v35 = vld [vmem:[#allocation10 + $0x8] sm:$0xff] }
  0xb9   :  { %1660 = vmatpush3.bf16.msra.mxu0 %v1659_v40  ;;  %v1748_v39 = vpack.c.bf16 %v844_v38, %v843_v37  ;;  %v845_v40 = vld [vmem:[#allocation7 + $0x70] sm:$0xff]  ;;  %v1778_v37 = vpack.c.bf16 %v1020_v35, %v1019_v34  ;;  %v1022_v38 = vld [vmem:[#allocation10 + $0x18] sm:$0xff] }
  0xba   :  { %1693 = vmatprep.subr.bf16.mxu0 %v1959_v46 }
  0xbb   :  { %1692 = vmatpush3.bf16.msra.mxu1 %v1691_v41  ;;  %v846_v41 = vld [vmem:[#allocation7 + $0x78] sm:$0xff] }
  0xbc   :  { %1729 = vmatprep.subr.bf16.mxu1 %v1959_v46  ;;  %685 = vmatmul.mubr.f32.vlgmr.msra.gmra.mrb[4].mxu0 %v107_v44  ;;  %v1751_v42 = vpack.c.bf16 %v846_v41, %v845_v40  ;;  %v1023_v40 = vld [vmem:[#allocation10 + $0x20] sm:$0xff]  ;;  %v1024_v41 = vld [vmem:[#allocation10 + $0x28] sm:$0xff] }
  0xbd   :  { %1695 = vmatpush1.bf16.msra.mxu0 %v1694_v45  ;;  %1131 = vmatprep.mubr.msk.f32.mxu0 %vm336_vm0, %v112_v50  ;;  %v1130_v45 = vld [vmem:[%s2150_s2] ss:$0 sm:$0xff] }
  0xbe   :  { %755 = vmatmul.mubr.f32.vlgmr.msra.gmra.mrb[4].mxu1 %v109_v47  ;;  %1696 = vmatprep.subr.bf16.mxu0 %v1959_v46 }
  0xbf   :  { %1731 = vmatpush3.bf16.msra.mxu1 %v1730_v22  ;;  %1428 = vmatprep.mubr.msk.f32.mxu1 %vm1960_vm1, %v1961_v43  ;;  %v933_v22 = vld [vmem:[#allocation8 + $0x40] sm:$0xff] }
  0xc0   :  { %1732 = vmatprep.subr.bf16.mxu1 %v1959_v46 }
  0xc1   :  { %1698 = vmatpush1.bf16.msra.mxu0 %v1697_v51 }
  0xc2   :  { %1699 = vmatprep.subr.bf16.mxu0 %v1959_v46 }
  0xc3   :  { %1734 = vmatpush3.bf16.msra.mxu1 %v1733_v24  ;;  %v1766_v24 = vpack.c.bf16 %v934_v23, %v933_v22 }
  0xc4   :  { %1735 = vmatprep.subr.bf16.mxu1 %v1959_v46 }
  0xc5   :  { %1701 = vmatpush1.bf16.msra.mxu0 %v1700_v54 }
  0xc6   :  { %1702 = vmatprep.subr.bf16.mxu0 %v1959_v46 }
  0xc7   :  { %1737 = vmatpush3.bf16.msra.mxu1 %v1736_v27  ;;  %v1769_v27 = vpack.c.bf16 %v936_v26, %v935_v25 }
  0xc8   :  { %1738 = vmatprep.subr.bf16.mxu1 %v1959_v46 }
  0xc9   :  { %1704 = vmatpush1.bf16.msra.mxu0 %v1703_v57 }
  0xca   :  { %1705 = vmatprep.subr.bf16.mxu0 %v1959_v46 }
  0xcb   :  { %1740 = vmatpush3.bf16.msra.mxu1 %v1739_v30  ;;  %v1772_v30 = vpack.c.bf16 %v938_v29, %v937_v28 }
  0xcc   :  { %1741 = vmatprep.subr.bf16.mxu1 %v1959_v46 }
  0xcd   :  { %1707 = vmatpush1.bf16.msra.mxu0 %v1706_v60 }
  0xce   :  { %1708 = vmatprep.subr.bf16.mxu0 %v1959_v46 }
  0xcf   :  { %1743 = vmatpush3.bf16.msra.mxu1 %v1742_v33  ;;  %v1775_v33 = vpack.c.bf16 %v940_v32, %v939_v31 }
  0xd0   :  { %1744 = vmatprep.subr.bf16.mxu1 %v1959_v46 }
  0xd1   :  { %1710 = vmatpush1.bf16.msra.mxu0 %v1709_v63 }
  0xd2   :  { %1711 = vmatprep.subr.bf16.mxu0 %v1959_v46 }
  0xd3   :  { %1746 = vmatpush3.bf16.msra.mxu1 %v1745_v36  ;;  %v1021_v36 = vld [vmem:[#allocation10 + $0x10] sm:$0xff] }
  0xd4   :  { %1747 = vmatprep.subr.bf16.mxu1 %v1959_v46 }
  0xd5   :  { %1713 = vmatpush1.bf16.msra.mxu0 %v1712_v2 }
  0xd6   :  { %1714 = vmatprep.subr.bf16.mxu0 %v1959_v46 }
  0xd7   :  { %1749 = vmatpush3.bf16.msra.mxu1 %v1748_v39  ;;  %v1781_v39 = vpack.c.bf16 %v1022_v38, %v1021_v36 }
  0xd8   :  { %1750 = vmatprep.subr.bf16.mxu1 %v1959_v46 }
  0xd9   :  { %1716 = vmatpush1.bf16.msra.mxu0 %v1715_v5 }
  0xda   :  { %1717 = vmatprep.subr.bf16.mxu0 %v1959_v46 }
  0xdb   :  { %1752 = vmatpush3.bf16.msra.mxu1 %v1751_v42  ;;  %v1784_v42 = vpack.c.bf16 %v1024_v41, %v1023_v40 }
  0xdc   :  { %1753 = vmatprep.subr.bf16.mxu1 %v1959_v46 }
  0xdd   :  { %1719 = vmatpush1.bf16.msra.mxu0 %v1718_v8 }
  0xde   :  { %1720 = vmatprep.subr.bf16.mxu0 %v1959_v46 }
  0xe1   :  { %1722 = vmatpush1.bf16.msra.mxu0 %v1721_v11  ;;  %v1754_v11 = vpack.c.bf16 %v926_v7, %v925_v6 }
  0xe2   :  { %1723 = vmatprep.subr.bf16.mxu0 %v1959_v46 }
  0xe5   :  { %1725 = vmatpush1.bf16.msra.mxu0 %v1724_v14  ;;  %v928_v14 = vld [vmem:[#allocation8 + $0x18] sm:$0xff] }
  0xe6   :  { %1726 = vmatprep.subr.bf16.mxu0 %v1959_v46  ;;  %v1757_v15 = vpack.c.bf16 %v928_v14, %v927_v13 }
  0xe9   :  { %1728 = vmatpush1.bf16.msra.mxu0 %v1727_v17  ;;  %v930_v17 = vld [vmem:[#allocation8 + $0x28] sm:$0xff] }
  0xea   :  { %1777 = vmatprep.subr.bf16.mxu0 %v1959_v46 }
  0xec   :  { %825 = vmatmul.mubr.f32.vlgmr.msra.gmra.mrb[6].mxu0 %v111_v18  ;;  %v1760_v18 = vpack.c.bf16 %v930_v17, %v929_v16 }
  0xed   :  { %1498 = vmatprep.mubr.msk.f32.mxu0 %vm1960_vm1, %v1961_v43  ;;  %1779 = vmatpush3.bf16.msra.mxu0 %v1778_v37 }
  0xee   :  { %1780 = vmatprep.subr.bf16.mxu0 %v1959_v46 }
  0xf1   :  { %1782 = vmatpush3.bf16.msra.mxu0 %v1781_v39 }
  0xf2   :  { %1783 = vmatprep.subr.bf16.mxu0 %v1959_v46 }
  0xf5   :  { %1785 = vmatpush3.bf16.msra.mxu0 %v1784_v42 }
  0xf6   :  { %1786 = vmatprep.subr.bf16.mxu0 %v1959_v46 }
 0x14f   :  { %v1167_v44 = vpop.f32.mrb[0].mxu0 }
 0x150   :  { %v1168_v47 = vpop.f32.mrb[1].mxu0 }
 0x151   :  { %v1202_v48 = vpop.f32.mrb[0].mxu1  ;;  %v1169_v49 = vadd.f32 %v1168_v47, %v1167_v44  ;;  %v1026_v44 = vld [vmem:[#allocation10 + $0x38] sm:$0xff]  ;;  %v1027_v47 = vld [vmem:[#allocation10 + $0x40] sm:$0xff] }
 0x152   :  { %v1203_v50 = vpop.f32.mrb[1].mxu1 }
 0x153   :  { %v1204_v51 = vadd.f32 %v1203_v50, %v1202_v48  ;;  %v407_v52 = vadd.f32 %v1169_v49, %v1130_v45  ;;  %v1028_v48 = vld [vmem:[#allocation10 + $0x48] sm:$0xff]  ;;  %v1029_v50 = vld [vmem:[#allocation10 + $0x50] sm:$0xff] }
 0x154   :  { %v1790_v49 = vpack.c.bf16 %v1028_v48, %v1027_v47 }
 0x155   :  { %v477_v53 = vadd.f32 %v1204_v51, %v407_v52  ;;  %v1030_v51 = vld [vmem:[#allocation10 + $0x58] sm:$0xff] }
 0x156   :  { %v1793_v52 = vpack.c.bf16 %v1030_v51, %v1029_v50 }
 0x16f   :  { %v1237_v54 = vpop.f32.mrb[2].mxu0 }
 0x170   :  { %v1238_v55 = vpop.f32.mrb[3].mxu0 }
 0x171   :  { %v1272_v56 = vpop.f32.mrb[2].mxu1  ;;  %v1239_v57 = vadd.f32 %v1238_v55, %v1237_v54  ;;  %v1032_v54 = vld [vmem:[#allocation10 + $0x68] sm:$0xff] }
 0x172   :  { %v1273_v58 = vpop.f32.mrb[3].mxu1 }
 0x173   :  { %v1274_v59 = vadd.f32 %v1273_v58, %v1272_v56  ;;  %v547_v60 = vadd.f32 %v1239_v57, %v477_v53  ;;  %v1031_v53 = vld [vmem:[#allocation10 + $0x60] sm:$0xff]  ;;  %v1132_v56 = vld [vmem:[%s2152_s4] ss:$0 sm:$0xff] }
 0x174   :  { %v1796_v55 = vpack.c.bf16 %v1032_v54, %v1031_v53 }
 0x175   :  { %v617_v61 = vadd.f32 %v1274_v59, %v547_v60 }
 0x18f   :  { %v1307_v62 = vpop.f32.mrb[4].mxu0 }
 0x190   :  { %v1308_v63 = vpop.f32.mrb[5].mxu0 }
 0x191   :  { %v1342_v0 = vpop.f32.mrb[4].mxu1  ;;  %v1309_v1 = vadd.f32 %v1308_v63, %v1307_v62  ;;  %v1034_v62 = vld [vmem:[#allocation10 + $0x78] sm:$0xff] }
 0x192   :  { %v1343_v2 = vpop.f32.mrb[5].mxu1 }
 0x193   :  { %v1344_v3 = vadd.f32 %v1343_v2, %v1342_v0  ;;  %v687_v4 = vadd.f32 %v1309_v1, %v617_v61  ;;  %v1033_v61 = vld [vmem:[#allocation10 + $0x70] sm:$0xff] }
 0x194   :  { %v1799_v63 = vpack.c.bf16 %v1034_v62, %v1033_v61  ;;  %v1133_v0 = vld [vmem:[%s2154_s6] ss:$0 sm:$0xff] }
 0x195   :  { %v757_v5 = vadd.f32 %v1344_v3, %v687_v4  ;;  %v1134_v4 = vld [vmem:[%s2156_s8] ss:$0 sm:$0xff] }
 0x1bf   :  { %v826_v8 = vpop.f32.mrb[6].mxu0 }
 0x1c0   :  { %v827_v9 = vadd.f32 %v826_v8, %v757_v5  ;;  %v828_v10 = vpop.f32.mrb[7].mxu0 }
 0x1c2   :  { %v830_v12 = vmax.f32 %v827_v9, 0.0 }
 0x1c4   :  { %1429 = vmatmul.mubr.f32.vlgmr.msra.gmra.mrb[6].mxu1 %v830_v12 }
 0x1c5   :  { %1755 = vmatpush3.bf16.msra.mxu1 %v1754_v11  ;;  %1463 = vmatprep.mubr.msk.f32.mxu1 %vm1960_vm1, %v1961_v43  ;;  %v1025_v43 = vld [vmem:[#allocation10 + $0x30] sm:$0xff] }
 0x1c6   :  { %1756 = vmatprep.subr.bf16.mxu1 %v1959_v46  ;;  %v1787_v45 = vpack.c.bf16 %v1026_v44, %v1025_v43 }
 0x1c8   :  { %1788 = vmatpush3.bf16.msra.mxu0 %v1787_v45 }
 0x1c9   :  { %1758 = vmatpush3.bf16.msra.mxu1 %v1757_v15  ;;  %1789 = vmatprep.subr.bf16.mxu0 %v1959_v46 }
 0x1ca   :  { %1759 = vmatprep.subr.bf16.mxu1 %v1959_v46 }
 0x1cc   :  { %1791 = vmatpush3.bf16.msra.mxu0 %v1790_v49 }
 0x1cd   :  { %1761 = vmatpush3.bf16.msra.mxu1 %v1760_v18  ;;  %1792 = vmatprep.subr.bf16.mxu0 %v1959_v46 }
 0x1ce   :  { %1762 = vmatprep.subr.bf16.mxu1 %v1959_v46 }
 0x1d0   :  { %1794 = vmatpush3.bf16.msra.mxu0 %v1793_v52 }
 0x1d1   :  { %1764 = vmatpush3.bf16.msra.mxu1 %v1763_v21  ;;  %1795 = vmatprep.subr.bf16.mxu0 %v1959_v46 }
 0x1d2   :  { %1765 = vmatprep.subr.bf16.mxu1 %v1959_v46 }
 0x1d4   :  { %1797 = vmatpush3.bf16.msra.mxu0 %v1796_v55 }
 0x1d5   :  { %1767 = vmatpush3.bf16.msra.mxu1 %v1766_v24  ;;  %1798 = vmatprep.subr.bf16.mxu0 %v1959_v46 }
 0x1d6   :  { %1768 = vmatprep.subr.bf16.mxu1 %v1959_v46 }
 0x1d8   :  { %1800 = vmatpush3.bf16.msra.mxu0 %v1799_v63 }
 0x1d9   :  { %1770 = vmatpush3.bf16.msra.mxu1 %v1769_v27 }
 0x1da   :  { %1771 = vmatprep.subr.bf16.mxu1 %v1959_v46 }
 0x1dd   :  { %1773 = vmatpush3.bf16.msra.mxu1 %v1772_v30 }
 0x1de   :  { %1774 = vmatprep.subr.bf16.mxu1 %v1959_v46 }
 0x1e1   :  { %1776 = vmatpush3.bf16.msra.mxu1 %v1775_v33 }
 0x297   :  { %v920_v57 = vpop.f32.mrb[6].mxu1 }
 0x298   :  { %v921_v58 = vadd.f32 %v1132_v56, %v920_v57  ;;  %v1430_v59 = vpop.f32.mrb[7].mxu1 }
 0x29a   :  { %v924_v60 = vmax.f32 %v921_v58, 0.0 }
 0x29c   :  { %1464 = vmatmul.mubr.f32.vlgmr.msra.gmra.mrb[8].mxu1 %v924_v60 }
 0x36f   :  { %v1014_v1 = vpop.f32.mrb[8].mxu1 }
 0x370   :  { %v1015_v2 = vadd.f32 %v1133_v0, %v1014_v1  ;;  %v1465_v46 = vpop.f32.mrb[9].mxu1 }
 0x372   :  { %v1018_v3 = vmax.f32 %v1015_v2, 0.0 }
 0x374   :  { %1499 = vmatmul.mubr.f32.vlgmr.msra.gmra.mrb[8].mxu0 %v1018_v3 }
 0x447   :  { %v1108_v5 = vpop.f32.mrb[8].mxu0 }
 0x448   :  { %v1109_v6 = vadd.f32 %v1134_v4, %v1108_v5  ;;  %v1500_v7 = vpop.f32.mrb[9].mxu0 }
 0x44a   :  { %1112 = vst [vmem:[#allocation11] sm:$0xff] %v1109_v6 }
 0x44b   :  { %1933 = shalt.err (!%p1930_p2)
}
 0x44c   :  { %s1934_s10 = scalar_lea.hbm %s2157_s9, 128 }
 0x44d   :  { %p1935_p3 = scmp.ne.s32.totalorder %s2157_s9, %s1934_s10  ;;  %p1938_p4 = scmp.lt.u32.totalorder %s1934_s10, %s2157_s9 }
 0x44f   :  { %p1940_p5 = pnand %p1938_p4, %p1935_p3 }
 0x451   :  { %1943 = shalt.err (!%p1940_p5)
}
 0x452   :  { %1122 = dma.vmem_to_hbm [thread:$0]  %s1120_s12, 128, %s2157_s9, [#allocation4]  }
 0x453   :  { %1950 = dma.done.wait [#allocation4], 128  }
 0x454   :  { %1951 = vsyncadd [#allocation4], 4294967168 }
 0x455   :  { %1126 = vsyncpa [#allocation3], 1 }
 0x456   :  { %1127 = vsyncpa [#allocation6], 1 }
 0x457   :  { %1128 = vsyncpa [#allocation9], 1 }
 0x458   :  { %1129 = vsyncpa [#allocation4], 1 }

</bundles_post_ra>
